<compile_context>
chip_gen: v6e
topology: v6e:2x2x1
jax: 0.10.0
libtpu: 0.0.40
codegen_flags: <defaults>
</compile_context>

<pallas_src>
import functools

import jax
import jax.numpy as jnp
from jax.experimental import pallas as pl
from jax.experimental.pallas import tpu as pltpu

_LANES = 128
_SUBLANES = 8


def _round_up(x, m):
    return ((x + m - 1) // m) * m


# ---------------------------------------------------------------------------
# Kernel 1: fused per-node projections  s = x @ w_src^T,  t = x @ w_tgt^T
# VPU broadcast-multiply + lane reduce (exact f32; the MXU would be <2%
# utilized here and x load is the bottleneck anyway).  Single (tile_n, 2)
# output block -> one output DMA stream per step.
# ---------------------------------------------------------------------------
def _node_proj_kernel(x_ref, w_ref, st_ref):
    xv = x_ref[...].astype(jnp.float32)
    w = w_ref[...].astype(jnp.float32)                      # (2, C)
    st_ref[:, 0:1] = jnp.sum(xv * w[0:1, :], axis=-1, keepdims=True)
    st_ref[:, 1:2] = jnp.sum(xv * w[1:2, :], axis=-1, keepdims=True)


def _node_projections(x, w_src, w_tgt):
    N, C = x.shape
    # ~2 MiB of node features per grid step, scaled with C.  When the whole
    # table fits in one block, use a full-extent block (no padding, no ragged).
    max_rows = max(_SUBLANES, ((2 << 20) // (4 * C)) // _SUBLANES * _SUBLANES)
    tile_n = N if N <= max_rows else max_rows
    grid_n = pl.cdiv(N, tile_n)                              # ragged last block OK

    w_st = jnp.stack([w_src.reshape(C), w_tgt.reshape(C)], axis=0).astype(jnp.float32)

    st = pl.pallas_call(
        _node_proj_kernel,
        out_shape=jax.ShapeDtypeStruct((N, 2), jnp.float32),
        grid_spec=pltpu.PrefetchScalarGridSpec(
            num_scalar_prefetch=0,
            grid=(grid_n,),
            in_specs=[
                pl.BlockSpec((tile_n, C), lambda i: (i, 0)),   # node features
                pl.BlockSpec((2, C), lambda i: (0, 0)),        # stacked [w_src; w_tgt]
            ],
            out_specs=pl.BlockSpec((tile_n, 2), lambda i: (i, 0)),
        ),
        compiler_params=pltpu.CompilerParams(dimension_semantics=("parallel",)),
    )(x, w_st)
    return st                                                # (N, 2) f32


# ---------------------------------------------------------------------------
# Kernel 2: per-edge gate, fully lane-dense.
#   nt_ref : (rows, 128)      gathered node term (s_j + t_i + bias), 128 edges/row
#   ea_ref : (rows, 128*D)    edge_attr packed 128 edges / row (free reshape)
#   wb_ref : (128*D, 128)     block-diagonal weight, Wb[j*D+d, j] = w_edge[d], bf16
#   out    : (rows, 128)      sigmoid gates, 128 edges / row (unmasked vst)
# One MXU dot per tile; bf16 operands (cast in-kernel), f32 accumulation.
# ---------------------------------------------------------------------------
def _edge_gate_kernel(nt_ref, ea_ref, wb_ref, out_ref):
    ea_bf16 = ea_ref[...].astype(jnp.bfloat16)               # VPU cast, no HBM pass
    e_contrib = jnp.dot(ea_bf16, wb_ref[...], preferred_element_type=jnp.float32)
    out_ref[...] = jax.nn.sigmoid(nt_ref[...] + e_contrib).astype(out_ref.dtype)


@functools.partial(jax.jit, static_argnames=("tile_e",))
def edge_gate_proj(x, edge_index, edge_attr, w_src, w_tgt, w_edge, bias,
                   *, tile_e=65536):
    """Pallas-backed EdgeGateProj forward.

    x          : (N, C)      node features
    edge_index : (2, E) int32
    edge_attr  : (E, D)      edge features
    w_src/w_tgt: (1, C)      Linear(in_channels, 1, bias=False) weights
    w_edge     : (1, D)      Linear(in_edgedim, 1, bias=False) weight
    bias       : (1,)        scalar bias (zeros if the module has no bias)
    returns    : (E, 1)      sigmoid edge gates
    """
    N, C = x.shape
    E = edge_index.shape[1]
    D = edge_attr.shape[1]

    # ---- Stage 1: project nodes, then gather scalars (E*4 B per stream). ----
    st = _node_projections(x, w_src, w_tgt)                  # (N, 2) f32

    # ---- Stage 2: per-edge gate, lane-dense packing. ----
    e_pad = _round_up(E, _LANES)
    if e_pad != E:
        # TODO(synk): a tiny plain-JAX epilogue for the <128-edge tail would
        # avoid this full copy; with 128-aligned E upstream no pad copy happens.
        edge_index = jnp.pad(edge_index, ((0, 0), (0, e_pad - E)))
        edge_attr = jnp.pad(edge_attr, ((0, e_pad - E), (0, 0)))
    n_rows = e_pad // _LANES

    # Gather two SCALARS per edge; fold the scalar bias in here (no SMEM operand).
    node_term = (jnp.take(st[:, 0], edge_index[0], axis=0)
                 + jnp.take(st[:, 1], edge_index[1], axis=0)
                 + bias.reshape(()).astype(jnp.float32))
    nt_packed = node_term.reshape(n_rows, _LANES)            # free reshape
    ea_packed = edge_attr.reshape(n_rows, _LANES * D)        # free reshape (f32 in HBM)

    # Block-diagonal edge weight in bf16, built via iota-compare (256 KiB).
    row = jax.lax.broadcasted_iota(jnp.int32, (_LANES * D, _LANES), 0)
    col = jax.lax.broadcasted_iota(jnp.int32, (_LANES * D, _LANES), 1)
    w_rep = jnp.tile(w_edge.reshape(D).astype(jnp.float32), _LANES)[:, None]
    wb = jnp.where(row // D == col, w_rep, 0.0).astype(jnp.bfloat16)

    # Tiling: up to 512 packed rows (65536 edges) per step; keep >= 2 grid steps
    # when there is enough work so v7x's two TensorCores can split the edges.
    rows_desired = max(tile_e // _LANES, _SUBLANES)
    if n_rows <= rows_desired:
        if n_rows >= 2 * _SUBLANES:
            rows_per_tile = _round_up(pl.cdiv(n_rows, 2), _SUBLANES)
        else:
            rows_per_tile = n_rows                           # tiny E: one full block
    else:
        rows_per_tile = rows_desired
    grid_e = pl.cdiv(n_rows, rows_per_tile)                  # ragged last block OK

    gates2d = pl.pallas_call(
        _edge_gate_kernel,
        out_shape=jax.ShapeDtypeStruct((n_rows, _LANES), x.dtype),
        grid_spec=pltpu.PrefetchScalarGridSpec(
            num_scalar_prefetch=0,
            grid=(grid_e,),
            in_specs=[
                pl.BlockSpec((rows_per_tile, _LANES), lambda i: (i, 0)),       # node term
                pl.BlockSpec((rows_per_tile, _LANES * D), lambda i: (i, 0)),   # packed edge_attr
                pl.BlockSpec((_LANES * D, _LANES), lambda i: (0, 0)),          # block-diag weight
            ],
            out_specs=pl.BlockSpec((rows_per_tile, _LANES), lambda i: (i, 0)),
        ),
        compiler_params=pltpu.CompilerParams(dimension_semantics=("parallel",)),
    )(nt_packed, ea_packed, wb)

    # Undo the lane-dense packing (padded gates sliced away).
    return gates2d.reshape(e_pad)[:E].reshape(E, 1)


def edge_gate_proj_ref(x, edge_index, edge_attr, w_src, w_tgt, w_edge, bias):
    """Pure-JAX reference mirroring the PyTorch forward (f32-exact matmuls)."""
    hi = jax.lax.Precision.HIGHEST
    x_j = jnp.take(x, edge_index[0], axis=0)
    x_i = jnp.take(x, edge_index[1], axis=0)
    g = (jnp.dot(x_j, w_src.T, precision=hi)
         + jnp.dot(x_i, w_tgt.T, precision=hi)
         + jnp.dot(edge_attr, w_edge.T, precision=hi)
         + bias.reshape(-1, 1))
    return jax.nn.sigmoid(g)


if __name__ == "__main__":
    initrange = 0.1
    root = jax.random.PRNGKey(0)

    def run_case(key, N, C, E, D):
        ks = jax.random.split(key, 7)
        x = jax.random.normal(ks[0], (N, C), dtype=jnp.float32)
        edge_index = jnp.stack([
            jax.random.randint(ks[1], (E,), 0, N, dtype=jnp.int32),
            jax.random.randint(ks[2], (E,), 0, N, dtype=jnp.int32),
        ], axis=0)
        edge_attr = jax.random.normal(ks[3], (E, D), dtype=jnp.float32)
        # reset_parameters(): uniform(-0.1, 0.1) weights, bias = 0.
        w_src = jax.random.uniform(ks[4], (1, C), jnp.float32, -initrange, initrange)
        w_tgt = jax.random.uniform(ks[5], (1, C), jnp.float32, -initrange, initrange)
        w_edge = jax.random.uniform(ks[6], (1, D), jnp.float32, -initrange, initrange)
        bias = jnp.zeros((1,), jnp.float32)

        out = jax.block_until_ready(
            edge_gate_proj(x, edge_index, edge_attr, w_src, w_tgt, w_edge, bias))
        ref = edge_gate_proj_ref(x, edge_index, edge_attr, w_src, w_tgt, w_edge, bias)
        assert out.shape == (E, 1)
        # bf16 operands on the edge-contribution matmul -> slightly relaxed tol.
        assert jnp.allclose(out, ref, atol=3e-3, rtol=0.0), \
            float(jnp.max(jnp.abs(out - ref)))

    k1, k2 = jax.random.split(root)
    run_case(k1, N=16, C=32, E=64, D=8)       # tiny: single block, padded tail
    run_case(k2, N=200, C=32, E=2500, D=8)    # ragged rows, 2-step edge grid
    print("KERNEL_OK")
</pallas_src>

<mosaic_0001>
module attributes {stable_mosaic.version = 11 : i64} {
  func.func @_node_proj_kernel(%arg0: i32, %arg1: memref<16x32xf32, #tpu.memory_space<vmem>>, %arg2: memref<2x32xf32, #tpu.memory_space<vmem>>, %arg3: memref<16x2xf32, #tpu.memory_space<vmem>>) attributes {dimension_semantics = [#tpu.dimension_semantics<parallel>], iteration_bounds = array<i64: 1>, scalar_prefetch = 0 : i64, scratch_operands = 0 : i64, tpu.core_type = #tpu.core_type<tc>, window_params = [{transform_indices = @transform_0, window_bounds = array<i64: 16, 32>}, {pipeline_mode = #tpu.pipeline_mode<synchronous>, transform_indices = @transform_1, window_bounds = array<i64: 2, 32>}, {transform_indices = @transform_2, window_bounds = array<i64: 16, 2>}]} {
    %c0 = arith.constant 0 : index
    %c0_0 = arith.constant 0 : index
    %0 = vector.load %arg1[%c0, %c0_0] : memref<16x32xf32, #tpu.memory_space<vmem>>, vector<16x32xf32>
    %c0_1 = arith.constant 0 : index
    %c0_2 = arith.constant 0 : index
    %1 = vector.load %arg2[%c0_1, %c0_2] : memref<2x32xf32, #tpu.memory_space<vmem>>, vector<2x32xf32>
    %2 = vector.extract_strided_slice %1 {offsets = [0, 0], sizes = [1, 32], strides = [1, 1]} : vector<2x32xf32> to vector<1x32xf32>
    %3 = vector.broadcast %2 : vector<1x32xf32> to vector<16x32xf32>
    %4 = arith.mulf %0, %3 : vector<16x32xf32>
    %cst = arith.constant dense<0.000000e+00> : vector<16xf32>
    %5 = vector.multi_reduction <add>, %4, %cst [1] : vector<16x32xf32> to vector<16xf32>
    %6 = vector.shape_cast %5 : vector<16xf32> to vector<16x1xf32>
    %c0_3 = arith.constant 0 : index
    %c0_4 = arith.constant 0 : index
    %7 = vector.load %arg3[%c0_3, %c0_4] : memref<16x2xf32, #tpu.memory_space<vmem>>, vector<16x1xf32>
    tpu.vector_store %arg3[%c0_3, %c0_4], %6 {strides = array<i32>} : memref<16x2xf32, #tpu.memory_space<vmem>>, vector<16x1xf32>,
    %8 = vector.extract_strided_slice %1 {offsets = [1, 0], sizes = [1, 32], strides = [1, 1]} : vector<2x32xf32> to vector<1x32xf32>
    %9 = vector.broadcast %8 : vector<1x32xf32> to vector<16x32xf32>
    %10 = arith.mulf %0, %9 : vector<16x32xf32>
    %cst_5 = arith.constant dense<0.000000e+00> : vector<16xf32>
    %11 = vector.multi_reduction <add>, %10, %cst_5 [1] : vector<16x32xf32> to vector<16xf32>
    %12 = vector.shape_cast %11 : vector<16xf32> to vector<16x1xf32>
    %c0_6 = arith.constant 0 : index
    %c1 = arith.constant 1 : index
    %13 = vector.load %arg3[%c0_6, %c1] : memref<16x2xf32, #tpu.memory_space<vmem>>, vector<16x1xf32>
    tpu.vector_store %arg3[%c0_6, %c1], %12 {strides = array<i32>} : memref<16x2xf32, #tpu.memory_space<vmem>>, vector<16x1xf32>,
    return
  }
  func.func @transform_0(%arg0: i32) -> (i32, i32) {
    %c0_i32 = arith.constant 0 : i32
    %c0_i32_0 = arith.constant 0 : i32
    return %arg0, %c0_i32 : i32, i32
  }
  func.func @transform_1(%arg0: i32) -> (i32, i32) {
    %c0_i32 = arith.constant 0 : i32
    %c0_i32_0 = arith.constant 0 : i32
    %c0_i32_1 = arith.constant 0 : i32
    return %c0_i32, %c0_i32_0 : i32, i32
  }
  func.func @transform_2(%arg0: i32) -> (i32, i32) {
    %c0_i32 = arith.constant 0 : i32
    %c0_i32_0 = arith.constant 0 : i32
    return %arg0, %c0_i32 : i32, i32
  }
}

module attributes {stable_mosaic.version = 11 : i64} {
  func.func @_edge_gate_kernel(%arg0: i32, %arg1: memref<1x128xf32, #tpu.memory_space<vmem>>, %arg2: memref<1x1024xf32, #tpu.memory_space<vmem>>, %arg3: memref<1024x128xbf16, #tpu.memory_space<vmem>>, %arg4: memref<1x128xf32, #tpu.memory_space<vmem>>) attributes {dimension_semantics = [#tpu.dimension_semantics<parallel>], iteration_bounds = array<i64: 1>, scalar_prefetch = 0 : i64, scratch_operands = 0 : i64, tpu.core_type = #tpu.core_type<tc>, window_params = [{transform_indices = @transform_0, window_bounds = array<i64: 1, 128>}, {transform_indices = @transform_1, window_bounds = array<i64: 1, 1024>}, {pipeline_mode = #tpu.pipeline_mode<synchronous>, transform_indices = @transform_2, window_bounds = array<i64: 1024, 128>}, {transform_indices = @transform_3, window_bounds = array<i64: 1, 128>}]} {
    %c0 = arith.constant 0 : index
    %c0_0 = arith.constant 0 : index
    %0 = vector.load %arg2[%c0, %c0_0] : memref<1x1024xf32, #tpu.memory_space<vmem>>, vector<1x1024xf32>
    %1 = arith.truncf %0 : vector<1x1024xf32> to vector<1x1024xbf16>
    %c0_1 = arith.constant 0 : index
    %c0_2 = arith.constant 0 : index
    %2 = vector.load %arg3[%c0_1, %c0_2] : memref<1024x128xbf16, #tpu.memory_space<vmem>>, vector<1024x128xbf16>
    %cst = arith.constant dense<0.000000e+00> : vector<1x128xf32>
    %3 = tpu.matmul %1, %2, %cst {dimension_numbers = #tpu.dot_dimension_numbers<[1], [0], [0], [1], [0, 0, 1, 1], [], []>} : vector<1x1024xbf16>, vector<1024x128xbf16>, vector<1x128xf32> -> vector<1x128xf32>
    %c0_3 = arith.constant 0 : index
    %c0_4 = arith.constant 0 : index
    %4 = vector.load %arg1[%c0_3, %c0_4] : memref<1x128xf32, #tpu.memory_space<vmem>>, vector<1x128xf32>
    %5 = arith.addf %4, %3 : vector<1x128xf32>
    %6 = arith.negf %5 : vector<1x128xf32>
    %7 = math.exp %6 : vector<1x128xf32>
    %cst_5 = arith.constant 1.000000e+00 : f32
    %8 = vector.broadcast %cst_5 : f32 to vector<1x128xf32>
    %9 = arith.addf %8, %7 : vector<1x128xf32>
    %10 = arith.divf %8, %9 : vector<1x128xf32>
    %c0_6 = arith.constant 0 : index
    %c0_7 = arith.constant 0 : index
    %11 = vector.load %arg4[%c0_6, %c0_7] : memref<1x128xf32, #tpu.memory_space<vmem>>, vector<1x128xf32>
    tpu.vector_store %arg4[%c0_6, %c0_7], %10 {strides = array<i32>} : memref<1x128xf32, #tpu.memory_space<vmem>>, vector<1x128xf32>,
    return
  }
  func.func @transform_0(%arg0: i32) -> (i32, i32) {
    %c0_i32 = arith.constant 0 : i32
    %c0_i32_0 = arith.constant 0 : i32
    return %arg0, %c0_i32 : i32, i32
  }
  func.func @transform_1(%arg0: i32) -> (i32, i32) {
    %c0_i32 = arith.constant 0 : i32
    %c0_i32_0 = arith.constant 0 : i32
    return %arg0, %c0_i32 : i32, i32
  }
  func.func @transform_2(%arg0: i32) -> (i32, i32) {
    %c0_i32 = arith.constant 0 : i32
    %c0_i32_0 = arith.constant 0 : i32
    %c0_i32_1 = arith.constant 0 : i32
    return %c0_i32, %c0_i32_0 : i32, i32
  }
  func.func @transform_3(%arg0: i32) -> (i32, i32) {
    %c0_i32 = arith.constant 0 : i32
    %c0_i32_0 = arith.constant 0 : i32
    return %arg0, %c0_i32 : i32, i32
  }
}

</mosaic_0001>

<bundles_post_ra>
// kernel: tile.6
= control target key start
LH: loop header
LB: loop body
LE: loop exit
PB: predicated region body
PF: predicated region fallthrough
CT: control target
= control target key end

     0   :  { %s151_s0 = inlined_call_operand.vmem [shape: f32[8], index: 0, kind: input, shape index: {}]   ;;  %s152_s1 = inlined_call_operand.vmem [shape: bf16[128,8], index: 1, kind: output, shape index: {}]  }
   0x1   :  { %v4_v0 = vld [vmem:[%s151_s0] ss:$0 sm:$0xff] }
   0x2   :  { %v70_v1 = vpack.c.bf16 %v4_v0, %v4_v0 }
   0x4   :  { %71 = vst [vmem:[%s152_s1] sm:$0xff] %v70_v1   ;;  %107 = vst [vmem:[%s152_s1 + $0x8] sm:$0xff] %v70_v1  }
   0x5   :  { %108 = vst [vmem:[%s152_s1 + $0x10] sm:$0xff] %v70_v1   ;;  %109 = vst [vmem:[%s152_s1 + $0x18] sm:$0xff] %v70_v1  }
   0x6   :  { %110 = vst [vmem:[%s152_s1 + $0x20] sm:$0xff] %v70_v1   ;;  %111 = vst [vmem:[%s152_s1 + $0x28] sm:$0xff] %v70_v1  }
   0x7   :  { %112 = vst [vmem:[%s152_s1 + $0x30] sm:$0xff] %v70_v1   ;;  %113 = vst [vmem:[%s152_s1 + $0x38] sm:$0xff] %v70_v1  }

// kernel: edge_gate_proj.2
= control target key start
LH: loop header
LB: loop body
LE: loop exit
PB: predicated region body
PF: predicated region fallthrough
CT: control target
= control target key end

     0   :  { %7 = vsyncpa [#allocation3], 0  ;;  %s89_s9 = smov [#allocation2]   ;;  %s125_s0 = inlined_call_operand.hbm [shape: f32[16,32], index: 0, kind: input, shape index: {}]   ;;  %s126_s1 = inlined_call_operand.vmem [shape: f32[2,32], index: 1, kind: input, shape index: {}]   ;;  %s127_s2 = inlined_call_operand.vmem [shape: f32[16,2], index: 2, kind: output, shape index: {}]  }
   0x1   :  { %s13_s10 = sshll.u32 %s89_s9, 4  ;;  %s14_s10 = int_to_ptr.vmem [resolvable:$true] %s13_s10 }
   0x2   :  { %s75_s11 = scalar_lea.vmem %s14_s10, 256  ;;  %p80_p1 = scmp.lt.s32.totalorder %s14_s10, %s14_s10 }
   0x3   :  { %p76_p0 = scmp.ne.s32.totalorder %s14_s10, %s75_s11  ;;  %p81_p2 = scmp.lt.s32.totalorder %s75_s11, %s75_s11 }
   0x5   :  { %p82_p3 = por %p81_p2, %p80_p1 }
   0x7   :  { %p83_p4 = pnand %p82_p3, %p76_p0 }
   0x9   :  { %86 = shalt.err (!%p83_p4)
}
   0xa   :  { %s90_s12 = smov 128   ;;  %s91_s13 = smov 8  }
   0xb   :  { %19 = dma.hbm_to_vmem [thread:$0]  %s125_s0, 256, %s14_s10, [#allocation3], %s90_s12, %s90_s12, %s91_s13  }
   0xc   :  { %87 = dma.done.wait [#allocation3], 256  }
   0xd   :  { %88 = vsyncadd [#allocation3], 4294967040  ;;  %v28_v0 = vlaneseq  ;;  %v25_v4 = vld [vmem:[#allocation2] sm:$0xff]  ;;  %v26_v6 = vld [vmem:[#allocation2 + $0x8] sm:$0xff]  ;;  %vm34_vm0 = vcmask 261120   ;;  %vm41_vm1 = vcmask 7168  }
   0xe   :  { %v27_v5 = vld [vmem:[%s126_s1] sm:$0x3]  ;;  %vm56_vm2 = vcmask 15368  }
   0xf   :  { %v29_v1 = vshrl.u32 %v28_v0, 7 }
  0x11   :  { %v30_v2 = vsub.s32 0, %v29_v1  ;;  %v46_v3 = vsub.s32 1, %v29_v1 }
  0x13   :  { %v31_v7 = vrot.slane %v27_v5, %v30_v2  ;;  %v47_v8 = vrot.slane %v27_v5, %v46_v3 }
  0x15   :  { %v32_v9 = vmul.f32 %v31_v7, %v25_v4  ;;  %v48_v10 = vmul.f32 %v47_v8, %v25_v4  ;;  %v33_v11 = vmul.f32 %v31_v7, %v26_v6  ;;  %v49_v12 = vmul.f32 %v47_v8, %v26_v6 }
  0x17   :  { %v35_v13 = vsel %vm34_vm0, %v32_v9, 0.0  ;;  %v50_v14 = vsel %vm34_vm0, %v48_v10, 0.0  ;;  %v38_v15 = vsel %vm34_vm0, %v33_v11, 0.0  ;;  %v53_v16 = vsel %vm34_vm0, %v49_v12, 0.0 }
  0x18   :  { %36 = vadd.xlane.f32.xlu0 %v35_v13  ;;  %51 = vadd.xlane.f32.xlu1 %v50_v14 }
  0x1c   :  { %39 = vadd.xlane.f32.xlu0 %v38_v15  ;;  %54 = vadd.xlane.f32.xlu1 %v53_v16 }
  0xa1   :  { %v37_v17 = vpop.xlane.xlu0 %36  ;;  %v52_v18 = vpop.xlane.xlu1 %51 }
  0xa2   :  { %42 = vst.msk [vmem:[%s127_s2] sm:$0xff] %vm41_vm1, %v37_v17 }
  0xa3   :  { %57 = vst.msk [vmem:[%s127_s2] sm:$0xff] %vm56_vm2, %v52_v18 }
  0xa5   :  { %v40_v19 = vpop.xlane.xlu0 %39  ;;  %v55_v20 = vpop.xlane.xlu1 %54 }
  0xa6   :  { %43 = vst.msk [vmem:[%s127_s2 + $0x8] sm:$0xff] %vm41_vm1, %v40_v19 }
  0xa7   :  { %58 = vst.msk [vmem:[%s127_s2 + $0x8] sm:$0xff] %vm56_vm2, %v55_v20 }
  0xa8   :  { %63 = vsyncpa [#allocation3], 1 }

// kernel: edge_gate_proj.3
= control target key start
LH: loop header
LB: loop body
LE: loop exit
PB: predicated region body
PF: predicated region fallthrough
CT: control target
= control target key end

     0   :  { %v17_v18 = vlaneseq  ;;  %s1212_s2 = inlined_call_operand.vmem [shape: bf16[1024,128], index: 2, kind: input, shape index: {}]   ;;  %s1213_s1 = inlined_call_operand.vmem [shape: f32[1,1024], index: 1, kind: input, shape index: {}]   ;;  %s1214_s0 = inlined_call_operand.vmem [shape: f32[1,128], index: 0, kind: input, shape index: {}]   ;;  %s1215_s3 = inlined_call_operand.vmem [shape: f32[1,128], index: 3, kind: output, shape index: {}]  }
   0x1   :  { %v903_v0 = vld [vmem:[%s1212_s2 + $0x78] sm:$0xff]   ;;  %v907_v4 = vld [vmem:[%s1212_s2 + $0x70] sm:$0xff]   ;;  %v911_v8 = vld [vmem:[%s1212_s2 + $0x68] sm:$0xff]  }
   0x2   :  { %v904_v1 = vld [vmem:[%s1212_s2 + $0xf8] sm:$0xff]   ;;  %815 = vmatprep.subr.bf16.mxu0 %v903_v0  ;;  %v908_v5 = vld [vmem:[%s1212_s2 + $0xf0] sm:$0xff]   ;;  %v912_v9 = vld [vmem:[%s1212_s2 + $0xe8] sm:$0xff]   ;;  %v1057_v23 = vshrl.u32 %v17_v18, 7 }
   0x3   :  { %v905_v2 = vld [vmem:[%s1212_s2 + $0x38] sm:$0xff]   ;;  %837 = vmatprep.subr.bf16.mxu1 %v904_v1  ;;  %v909_v6 = vld [vmem:[%s1212_s2 + $0x30] sm:$0xff]   ;;  %v913_v10 = vld [vmem:[%s1212_s2 + $0x28] sm:$0xff]  }
   0x4   :  { %v906_v3 = vld [vmem:[%s1212_s2 + $0xb8] sm:$0xff]   ;;  %816 = vmatpush3.bf16.msra.mxu0 %v905_v2  ;;  %v910_v7 = vld [vmem:[%s1212_s2 + $0xb0] sm:$0xff]   ;;  %v914_v11 = vld [vmem:[%s1212_s2 + $0xa8] sm:$0xff]   ;;  %v23_v28 = vsub.s32 1, %v1057_v23  ;;  %v31_v30 = vsub.s32 3, %v1057_v23  ;;  %v19_v32 = vsub.s32 0, %v1057_v23 }
   0x5   :  { %838 = vmatpush3.bf16.msra.mxu1 %v906_v3  ;;  %817 = vmatprep.subr.bf16.mxu0 %v907_v4  ;;  %v915_v12 = vld [vmem:[%s1212_s2 + $0x60] sm:$0xff]   ;;  %v919_v16 = vld [vmem:[%s1212_s2 + $0x58] sm:$0xff]   ;;  %v923_v21 = vld [vmem:[%s1212_s2 + $0x50] sm:$0xff]   ;;  %v27_v34 = vsub.s32 2, %v1057_v23  ;;  %v39_v36 = vsub.s32 5, %v1057_v23  ;;  %v47_v38 = vsub.s32 7, %v1057_v23 }
   0x6   :  { %839 = vmatprep.subr.bf16.mxu1 %v908_v5  ;;  %v916_v13 = vld [vmem:[%s1212_s2 + $0xe0] sm:$0xff]   ;;  %v920_v17 = vld [vmem:[%s1212_s2 + $0xd8] sm:$0xff]   ;;  %v924_v22 = vld [vmem:[%s1212_s2 + $0xd0] sm:$0xff]  }
   0x7   :  { %v917_v14 = vld [vmem:[%s1212_s2 + $0x20] sm:$0xff]   ;;  %v921_v19 = vld [vmem:[%s1212_s2 + $0x18] sm:$0xff]   ;;  %v925_v24 = vld [vmem:[%s1212_s2 + $0x10] sm:$0xff]  }
   0x8   :  { %818 = vmatpush3.bf16.msra.mxu0 %v909_v6  ;;  %v918_v15 = vld [vmem:[%s1212_s2 + $0xa0] sm:$0xff]   ;;  %v922_v20 = vld [vmem:[%s1212_s2 + $0x98] sm:$0xff]   ;;  %v926_v25 = vld [vmem:[%s1212_s2 + $0x90] sm:$0xff]  }
   0x9   :  { %840 = vmatpush3.bf16.msra.mxu1 %v910_v7  ;;  %819 = vmatprep.subr.bf16.mxu0 %v911_v8  ;;  %v927_v26 = vld [vmem:[%s1212_s2 + $0x48] sm:$0xff]   ;;  %v931_v33 = vld [vmem:[%s1212_s2 + $0x40] sm:$0xff]   ;;  %v935_v45 = vld [vmem:[%s1212_s2 + $0x178] sm:$0xff]  }
   0xa   :  { %841 = vmatprep.subr.bf16.mxu1 %v912_v9  ;;  %v928_v27 = vld [vmem:[%s1212_s2 + $0xc8] sm:$0xff]   ;;  %v932_v35 = vld [vmem:[%s1212_s2 + $0xc0] sm:$0xff]   ;;  %v936_v46 = vld [vmem:[%s1212_s2 + $0x1f8] sm:$0xff]  }
   0xb   :  { %v929_v29 = vld [vmem:[%s1212_s2 + $0x8] sm:$0xff]   ;;  %v933_v37 = vld [vmem:[%s1212_s2] sm:$0xff]   ;;  %v937_v53 = vld [vmem:[%s1212_s2 + $0x138] sm:$0xff]  }
   0xc   :  { %820 = vmatpush3.bf16.msra.mxu0 %v913_v10  ;;  %v930_v31 = vld [vmem:[%s1212_s2 + $0x88] sm:$0xff]   ;;  %v934_v39 = vld [vmem:[%s1212_s2 + $0x80] sm:$0xff]   ;;  %v938_v54 = vld [vmem:[%s1212_s2 + $0x1b8] sm:$0xff]  }
   0xd   :  { %842 = vmatpush3.bf16.msra.mxu1 %v914_v11  ;;  %821 = vmatprep.subr.bf16.mxu0 %v915_v12  ;;  %v1098_v40 = vld [vmem:[%s1213_s1] sm:$0xff]  ;;  %v939_v55 = vld [vmem:[%s1212_s2 + $0x170] sm:$0xff]   ;;  %v943_v61 = vld [vmem:[%s1212_s2 + $0x168] sm:$0xff]  }
   0xe   :  { %843 = vmatprep.subr.bf16.mxu1 %v916_v13  ;;  %v24_v41 = vrot.slane %v1098_v40, %v23_v28  ;;  %v32_v42 = vrot.slane %v1098_v40, %v31_v30  ;;  %v20_v43 = vrot.slane %v1098_v40, %v19_v32  ;;  %v28_v44 = vrot.slane %v1098_v40, %v27_v34  ;;  %v940_v58 = vld [vmem:[%s1212_s2 + $0x1f0] sm:$0xff]   ;;  %v944_v62 = vld [vmem:[%s1212_s2 + $0x1e8] sm:$0xff]   ;;  %v947_v1 = vld [vmem:[%s1212_s2 + $0x160] sm:$0xff]  }
   0xf   :  { %v40_v47 = vrot.slane %v1098_v40, %v39_v36  ;;  %v48_v48 = vrot.slane %v1098_v40, %v47_v38  ;;  %v941_v59 = vld [vmem:[%s1212_s2 + $0x130] sm:$0xff]   ;;  %v945_v63 = vld [vmem:[%s1212_s2 + $0x128] sm:$0xff]   ;;  %v948_v2 = vld [vmem:[%s1212_s2 + $0x1e0] sm:$0xff]  }
  0x10   :  { %822 = vmatpush3.bf16.msra.mxu0 %v917_v14  ;;  %v58_v49 = vpack.c.bf16 %v24_v41, %v24_v41  ;;  %v60_v50 = vpack.c.bf16 %v32_v42, %v32_v42  ;;  %v57_v51 = vpack.c.bf16 %v20_v43, %v20_v43  ;;  %v59_v52 = vpack.c.bf16 %v28_v44, %v28_v44  ;;  %v942_v60 = vld [vmem:[%s1212_s2 + $0x1b0] sm:$0xff]   ;;  %v946_v0 = vld [vmem:[%s1212_s2 + $0x1a8] sm:$0xff]   ;;  %v949_v3 = vld [vmem:[%s1212_s2 + $0x120] sm:$0xff]  }
  0x11   :  { %844 = vmatpush3.bf16.msra.mxu1 %v918_v15  ;;  %823 = vmatprep.subr.bf16.mxu0 %v919_v16  ;;  %v62_v56 = vpack.c.bf16 %v40_v47, %v40_v47  ;;  %v64_v57 = vpack.c.bf16 %v48_v48, %v48_v48  ;;  %v950_v4 = vld [vmem:[%s1212_s2 + $0x1a0] sm:$0xff]   ;;  %v951_v5 = vld [vmem:[%s1212_s2 + $0x158] sm:$0xff]   ;;  %v955_v9 = vld [vmem:[%s1212_s2 + $0x150] sm:$0xff]   ;;  %v35_v14 = vsub.s32 4, %v1057_v23  ;;  %v43_v16 = vsub.s32 6, %v1057_v23 }
  0x12   :  { %845 = vmatprep.subr.bf16.mxu1 %v920_v17  ;;  %609 = vmatprep.mubr.bf16.mxu0 %v58_v49  ;;  %v952_v6 = vld [vmem:[%s1212_s2 + $0x1d8] sm:$0xff]   ;;  %v956_v10 = vld [vmem:[%s1212_s2 + $0x1d0] sm:$0xff]   ;;  %v959_v13 = vld [vmem:[%s1212_s2 + $0x148] sm:$0xff]  }
  0x13   :  { %649 = vmatprep.mubr.bf16.mxu1 %v60_v50  ;;  %v953_v7 = vld [vmem:[%s1212_s2 + $0x118] sm:$0xff]   ;;  %v957_v11 = vld [vmem:[%s1212_s2 + $0x110] sm:$0xff]   ;;  %v960_v15 = vld [vmem:[%s1212_s2 + $0x1c8] sm:$0xff]  }
  0x14   :  { %824 = vmatpush3.bf16.msra.mxu0 %v921_v19  ;;  %v954_v8 = vld [vmem:[%s1212_s2 + $0x198] sm:$0xff]   ;;  %v958_v12 = vld [vmem:[%s1212_s2 + $0x190] sm:$0xff]   ;;  %v961_v17 = vld [vmem:[%s1212_s2 + $0x108] sm:$0xff]  }
  0x15   :  { %846 = vmatpush3.bf16.msra.mxu1 %v922_v20  ;;  %825 = vmatprep.subr.bf16.mxu0 %v923_v21  ;;  %v962_v18 = vld [vmem:[%s1212_s2 + $0x188] sm:$0xff]   ;;  %v963_v19 = vld [vmem:[%s1212_s2 + $0x140] sm:$0xff]   ;;  %v36_v21 = vrot.slane %v1098_v40, %v35_v14 }
  0x16   :  { %847 = vmatprep.subr.bf16.mxu1 %v924_v22  ;;  %v964_v20 = vld [vmem:[%s1212_s2 + $0x1c0] sm:$0xff]   ;;  %v44_v22 = vrot.slane %v1098_v40, %v43_v16 }
  0x17   :  { %v965_v23 = vld [vmem:[%s1212_s2 + $0x100] sm:$0xff]  }
  0x18   :  { %826 = vmatpush3.bf16.msra.mxu0 %v925_v24  ;;  %v966_v24 = vld [vmem:[%s1212_s2 + $0x180] sm:$0xff]  }
  0x19   :  { %848 = vmatpush3.bf16.msra.mxu1 %v926_v25  ;;  %827 = vmatprep.subr.bf16.mxu0 %v927_v26  ;;  %v61_v25 = vpack.c.bf16 %v36_v21, %v36_v21  ;;  %v63_v26 = vpack.c.bf16 %v44_v22, %v44_v22  ;;  %v737_v47 = vld [vmem:[%s1214_s0] sm:$0x1] }
  0x1a   :  { %849 = vmatprep.subr.bf16.mxu1 %v928_v27 }
  0x1c   :  { %828 = vmatpush3.bf16.msra.mxu0 %v929_v29 }
  0x1d   :  { %850 = vmatpush3.bf16.msra.mxu1 %v930_v31  ;;  %829 = vmatprep.subr.bf16.mxu0 %v931_v33 }
  0x1e   :  { %851 = vmatprep.subr.bf16.mxu1 %v932_v35 }
  0x20   :  { %830 = vmatpush3.bf16.msra.mxu0 %v933_v37 }
  0x21   :  { %852 = vmatpush3.bf16.msra.mxu1 %v934_v39  ;;  %859 = vmatprep.subr.bf16.mxu0 %v935_v45 }
  0x22   :  { %881 = vmatprep.subr.bf16.mxu1 %v936_v46 }
  0x23   :  { %610 = vmatmul.mubr.bf16.vlgmr.msra.gmra.mxu0 %v57_v51 }
  0x24   :  { %650 = vmatmul.mubr.bf16.vlgmr.msra.gmra.mxu1 %v59_v52  ;;  %860 = vmatpush3.bf16.msra.mxu0 %v937_v53 }
  0x25   :  { %882 = vmatpush3.bf16.msra.mxu1 %v938_v54  ;;  %861 = vmatprep.subr.bf16.mxu0 %v939_v55 }
  0x26   :  { %883 = vmatprep.subr.bf16.mxu1 %v940_v58  ;;  %689 = vmatprep.mubr.bf16.mxu0 %v62_v56 }
  0x27   :  { %729 = vmatprep.mubr.bf16.mxu1 %v64_v57 }
  0x28   :  { %862 = vmatpush3.bf16.msra.mxu0 %v941_v59 }
  0x29   :  { %884 = vmatpush3.bf16.msra.mxu1 %v942_v60  ;;  %863 = vmatprep.subr.bf16.mxu0 %v943_v61 }
  0x2a   :  { %885 = vmatprep.subr.bf16.mxu1 %v944_v62 }
  0x2c   :  { %864 = vmatpush3.bf16.msra.mxu0 %v945_v63 }
  0x2d   :  { %886 = vmatpush3.bf16.msra.mxu1 %v946_v0  ;;  %865 = vmatprep.subr.bf16.mxu0 %v947_v1 }
  0x2e   :  { %887 = vmatprep.subr.bf16.mxu1 %v948_v2 }
  0x30   :  { %866 = vmatpush3.bf16.msra.mxu0 %v949_v3 }
  0x31   :  { %888 = vmatpush3.bf16.msra.mxu1 %v950_v4  ;;  %867 = vmatprep.subr.bf16.mxu0 %v951_v5 }
  0x32   :  { %889 = vmatprep.subr.bf16.mxu1 %v952_v6 }
  0x34   :  { %868 = vmatpush3.bf16.msra.mxu0 %v953_v7 }
  0x35   :  { %890 = vmatpush3.bf16.msra.mxu1 %v954_v8  ;;  %869 = vmatprep.subr.bf16.mxu0 %v955_v9 }
  0x36   :  { %891 = vmatprep.subr.bf16.mxu1 %v956_v10 }
  0x38   :  { %870 = vmatpush3.bf16.msra.mxu0 %v957_v11 }
  0x39   :  { %892 = vmatpush3.bf16.msra.mxu1 %v958_v12  ;;  %871 = vmatprep.subr.bf16.mxu0 %v959_v13 }
  0x3a   :  { %893 = vmatprep.subr.bf16.mxu1 %v960_v15 }
  0x3c   :  { %872 = vmatpush3.bf16.msra.mxu0 %v961_v17 }
  0x3d   :  { %894 = vmatpush3.bf16.msra.mxu1 %v962_v18  ;;  %873 = vmatprep.subr.bf16.mxu0 %v963_v19 }
  0x3e   :  { %895 = vmatprep.subr.bf16.mxu1 %v964_v20 }
  0x40   :  { %874 = vmatpush3.bf16.msra.mxu0 %v965_v23 }
  0x41   :  { %896 = vmatpush3.bf16.msra.mxu1 %v966_v24 }
  0x43   :  { %690 = vmatmul.mubr.bf16.vlgmr.msra.gmra.mxu0 %v61_v25 }
  0x44   :  { %730 = vmatmul.mubr.bf16.vlgmr.msra.gmra.mxu1 %v63_v26 }
  0xe3   :  { %v831_v27 = vpop.f32.mrf.mxu0 }
  0xe4   :  { %v853_v28 = vpop.f32.mrf.mxu1 }
  0xe5   :  { %v832_v29 = vpop.f32.mrf.mxu0 }
  0xe6   :  { %v854_v30 = vpop.f32.mrf.mxu1  ;;  %v833_v35 = vadd.f32 %v832_v29, %v831_v27 }
  0xe7   :  { %v834_v31 = vpop.f32.mrf.mxu0  ;;  %v855_v36 = vadd.f32 %v854_v30, %v853_v28 }
  0xe8   :  { %v856_v32 = vpop.f32.mrf.mxu1 }
  0xe9   :  { %v835_v33 = vpop.f32.mrf.mxu0  ;;  %v652_v41 = vadd.f32 %v855_v36, %v833_v35 }
  0xea   :  { %v857_v34 = vpop.f32.mrf.mxu1 }
 0x103   :  { %v875_v37 = vpop.f32.mrf.mxu0 }
 0x104   :  { %v897_v38 = vpop.f32.mrf.mxu1 }
 0x105   :  { %v876_v39 = vpop.f32.mrf.mxu0 }
 0x106   :  { %v898_v40 = vpop.f32.mrf.mxu1  ;;  %v877_v42 = vadd.f32 %v876_v39, %v875_v37 }
 0x107   :  { %v878_v43 = vpop.f32.mrf.mxu0  ;;  %v899_v46 = vadd.f32 %v898_v40, %v897_v38 }
 0x108   :  { %v900_v44 = vpop.f32.mrf.mxu1  ;;  %v692_v45 = vadd.f32 %v877_v42, %v652_v41 }
 0x109   :  { %v879_v48 = vpop.f32.mrf.mxu0 }
 0x10a   :  { %v901_v49 = vpop.f32.mrf.mxu1  ;;  %v732_v50 = vadd.f32 %v899_v46, %v692_v45 }
 0x10c   :  { %v738_v51 = vadd.f32 %v737_v47, %v732_v50 }
 0x10e   :  { %v814_v52 = vmul.f32 -1.442695, %v738_v51 }
 0x110   :  { %967 = vpow2.f32 %v814_v52 }
 0x11d   :  { %v968_v53 = vpop.eup %967 }
 0x11e   :  { %v742_v54 = vadd.f32 1.0, %v968_v53 }
 0x120   :  { %969 = vrcp.f32 %v742_v54 }
 0x12d   :  { %v970_v55 = vpop.eup %969 }
 0x12e   :  { %745 = vst [vmem:[%s1215_s3] sm:$0x1] %v970_v55 }

</bundles_post_ra>
